<compile_context>
chip_gen: v6e
topology: v6e:2x2x1
jax: 0.10.0
libtpu: 0.0.40
codegen_flags: <defaults>
</compile_context>

<pallas_src>
import jax
import jax.numpy as jnp
from jax.experimental import pallas as pl
from jax.experimental.pallas import tpu as pltpu


def _round_up(x: int, m: int) -> int:
    return (x + m - 1) // m * m


def neuralnet_kernel(k_ref, q_ref, w1_ref, b1_ref, w2_ref, b2_ref, o_ref):
    # k_ref : (TB, 10*512) VMEM   -- candidate j lives in lanes [j*512, (j+1)*512)
    # q_ref : (TB, 512)    VMEM
    # w1_ref: (1, 2) SMEM ; b1_ref/b2_ref: (1,) SMEM ; w2_ref: (1, 512) VMEM f32
    # o_ref : (1, TB)      VMEM   -- lane-dense output row (batch on lanes)
    tb, d = q_ref.shape
    nc = k_ref.shape[1] // d                   # number of candidates (10)

    w1_q = w1_ref[0, 0]                        # scalar weight on the q channel
    w1_k = w1_ref[0, 1]                        # scalar weight on the k channel
    b1 = b1_ref[0]
    b2 = b2_ref[0]
    w2 = w2_ref[...]                           # (1, d) f32

    # fc2_1's q contribution is identical for all candidates: hoist it.
    # .astype is a no-op for f32 inputs; upcast when streaming bf16 activations.
    qa = q_ref[...].astype(jnp.float32) * w1_q + b1        # (TB, d)

    acc = jnp.zeros(o_ref.shape, jnp.float32)              # (1, TB)
    # Static unroll over nc=10 candidates: slices are static, lane-aligned
    # ref views (zero cost).  A fori_loop body would need a dynamic lane-dim
    # slice; review notes the unrolled form is perf-neutral while HBM-bound.
    for j in range(nc):
        kj = k_ref[:, j * d:(j + 1) * d].astype(jnp.float32)   # (TB, d)
        h = jnp.maximum(qa + kj * w1_k, 0.0)                   # fc2_1 + ReLU
        # fc2_2 (Linear(d, 1)) on the MXU.  NT-form matmul (contraction on the
        # lane dim of both operands, like flash-attention q@k^T) -> no explicit
        # XLU transpose of h, lane-dense (1, TB) result.
        y = jax.lax.dot_general(w2, h, (((1,), (1,)), ((), ())),
                                preferred_element_type=jnp.float32)
        acc = acc + jnp.maximum(y + b2, 0.0)                   # ReLU + accumulate

    o_ref[...] = acc * (1.0 / nc)                              # mean over candidates


def _choose_batch_tile(bs: int, batch_tile: int) -> int:
    # Tiny batches: a single grid step whose block equals the full array
    # (exempt from (8,128) divisibility; zero padding of any kind).
    if bs < 256:
        return bs
    # Otherwise: >= 2 balanced steps (so "parallel" batch axis can shard across
    # TensorCores on v7x), each <= batch_tile, 128-aligned so every non-final
    # output block is lane-dense.
    n_steps = max(2, pl.cdiv(bs, batch_tile))
    return _round_up(pl.cdiv(bs, n_steps), 128)


def neuralnet_forward(k, q, w1, b1, w2, b2, *, batch_tile=512):
    bs, nc, d = k.shape                        # (bs, 10, 512)
    assert q.shape == (bs, 1, d)

    # Row-major views: candidates*features flattened onto the lane axis so the
    # candidate dim never hits the padded sublane axis.
    k2 = k.reshape(bs, nc * d)
    q2 = q.reshape(bs, d)

    # Params in f32 regardless of how activations are streamed.
    w1 = w1.astype(jnp.float32)
    b1 = b1.astype(jnp.float32)
    w2 = w2.astype(jnp.float32)
    b2 = b2.astype(jnp.float32)

    tb = _choose_batch_tile(bs, batch_tile)
    n_steps = pl.cdiv(bs, tb)
    # No input padding: the last batch block may be partial.  Only the tiny
    # output row is over-allocated so its stores never go out of bounds.
    out_cols = n_steps * tb

    itemsize = k2.dtype.itemsize
    flops = 6 * bs * nc * d
    bytes_accessed = (itemsize * (k2.size + q2.size)
                      + 4 * (w1.size + b1.size + w2.size + b2.size)
                      + 4 * out_cols)

    out = pl.pallas_call(
        neuralnet_kernel,
        out_shape=jax.ShapeDtypeStruct((1, out_cols), jnp.float32),
        grid=(n_steps,),
        in_specs=[
            pl.BlockSpec((tb, nc * d), lambda i: (i, 0)),          # k tile (streamed)
            pl.BlockSpec((tb, d), lambda i: (i, 0)),               # q tile (streamed)
            pl.BlockSpec(memory_space=pltpu.MemorySpace.SMEM),     # w1 (1, 2)
            pl.BlockSpec(memory_space=pltpu.MemorySpace.SMEM),     # b1 (1,)
            pl.BlockSpec((1, d), lambda i: (0, 0)),                # w2 (1, 512), fetched once
            pl.BlockSpec(memory_space=pltpu.MemorySpace.SMEM),     # b2 (1,)
        ],
        out_specs=pl.BlockSpec((1, tb), lambda i: (0, i)),          # lane-dense output
        compiler_params=pltpu.CompilerParams(
            dimension_semantics=("parallel",),                      # shard batch across TCs
            vmem_limit_bytes=48 * 1024 * 1024,                      # fits v7x's 64 MiB/TC
        ),
        cost_estimate=pl.CostEstimate(flops=flops, transcendentals=0,
                                      bytes_accessed=int(bytes_accessed)),
    )(k2, q2, w1, b1, w2, b2)

    # Lanes >= bs (partial last block) hold garbage from clamped DMAs; each
    # output lane is independent, so this slice is the only masking needed.
    return out[0, :bs][:, None]                                    # (bs, 1)


def reference_forward(k, q, w1, b1, w2, b2):
    """Pure-JAX transcription of the PyTorch forward for validation."""
    bs = k.shape[0]
    q10 = jnp.tile(q, (1, 10, 1))                             # (bs, 10, 512)
    x2 = jnp.concatenate((q10, k), axis=2)                    # (bs, 10, 1024)
    x2 = x2.reshape(bs * 10, 2, 512)
    x2 = jnp.transpose(x2, (0, 2, 1))                         # (bs*10, 512, 2)
    x2 = x2 @ w1.T + b1                                       # Linear(2,1)
    x2 = jnp.maximum(x2, 0.0)
    x2 = x2.reshape(bs, 10, 512)
    x2 = x2 @ w2.T + b2                                       # Linear(512,1)
    x2 = jnp.maximum(x2, 0.0)
    x2 = x2.reshape(bs, 10)
    return jnp.mean(x2, axis=1)[:, None]                      # (bs, 1)


if __name__ == "__main__":
    key = jax.random.PRNGKey(0)
    k_in, k_q, k_w1, k_b1, k_w2, k_b2 = jax.random.split(key, 6)

    w1 = jax.random.uniform(k_w1, (1, 2), jnp.float32,
                            minval=-(2.0 ** -0.5), maxval=2.0 ** -0.5)
    b1 = jax.random.uniform(k_b1, (1,), jnp.float32,
                            minval=-(2.0 ** -0.5), maxval=2.0 ** -0.5)
    w2 = jax.random.uniform(k_w2, (1, 512), jnp.float32,
                            minval=-(512.0 ** -0.5), maxval=512.0 ** -0.5)
    b2 = jax.random.uniform(k_b2, (1,), jnp.float32,
                            minval=-(512.0 ** -0.5), maxval=512.0 ** -0.5)

    # Case 1: small batch -> single grid step, block == full array, no padding.
    bs = 2
    k = jax.random.normal(k_in, (bs, 10, 512), dtype=jnp.float32)
    q = jax.random.normal(k_q, (bs, 1, 512), dtype=jnp.float32)
    out = jax.block_until_ready(neuralnet_forward(k, q, w1, b1, w2, b2))
    ref = reference_forward(k, q, w1, b1, w2, b2)
    assert out.shape == (bs, 1), out.shape
    assert jnp.allclose(out, ref, atol=1e-4, rtol=1e-4), (out, ref)

    # Case 2: bs not a multiple of the tile -> 2 grid steps with a ragged last
    # input block and NO wrapper-side padding copy of k/q.
    bs2 = 300
    k_b = jax.random.normal(k_in, (bs2, 10, 512), dtype=jnp.float32)
    q_b = jax.random.normal(k_q, (bs2, 1, 512), dtype=jnp.float32)
    out2 = jax.block_until_ready(neuralnet_forward(k_b, q_b, w1, b1, w2, b2))
    ref2 = reference_forward(k_b, q_b, w1, b1, w2, b2)
    assert out2.shape == (bs2, 1), out2.shape
    assert jnp.allclose(out2, ref2, atol=1e-4, rtol=1e-4)

    # Case 3: bf16-streamed activations (halves HBM traffic); params stay f32,
    # kernel upcasts, so only input-quantization error remains.
    out3 = jax.block_until_ready(
        neuralnet_forward(k_b.astype(jnp.bfloat16), q_b.astype(jnp.bfloat16),
                          w1, b1, w2, b2))
    assert out3.shape == (bs2, 1), out3.shape
    assert jnp.allclose(out3, ref2, atol=2e-2, rtol=2e-2)

    print("KERNEL_OK")
</pallas_src>

<mosaic_0001>
module attributes {stable_mosaic.version = 11 : i64} {
  func.func @neuralnet_kernel(%arg0: i32, %arg1: memref<2x5120xf32, #tpu.memory_space<vmem>>, %arg2: memref<2x512xf32, #tpu.memory_space<vmem>>, %arg3: memref<1x2xf32, #tpu.memory_space<smem>>, %arg4: memref<1xf32, #tpu.memory_space<smem>>, %arg5: memref<1x512xf32, #tpu.memory_space<vmem>>, %arg6: memref<1xf32, #tpu.memory_space<smem>>, %arg7: memref<1x2xf32, #tpu.memory_space<vmem>>) attributes {dimension_semantics = [#tpu.dimension_semantics<parallel>], iteration_bounds = array<i64: 1>, scalar_prefetch = 0 : i64, scratch_operands = 0 : i64, tpu.core_type = #tpu.core_type<tc>, window_params = [{transform_indices = @transform_0, window_bounds = array<i64: 2, 5120>}, {transform_indices = @transform_1, window_bounds = array<i64: 2, 512>}, {transform_indices = @transform_2, window_bounds = array<i64: 1, 2>}, {transform_indices = @transform_3, window_bounds = array<i64: 1>}, {pipeline_mode = #tpu.pipeline_mode<synchronous>, transform_indices = @transform_4, window_bounds = array<i64: 1, 512>}, {transform_indices = @transform_5, window_bounds = array<i64: 1>}, {transform_indices = @transform_6, window_bounds = array<i64: 1, 2>}]} {
    %c0 = arith.constant 0 : index
    %c0_0 = arith.constant 0 : index
    %0 = memref.load %arg3[%c0, %c0_0] : memref<1x2xf32, #tpu.memory_space<smem>>
    %c0_1 = arith.constant 0 : index
    %c1 = arith.constant 1 : index
    %1 = memref.load %arg3[%c0_1, %c1] : memref<1x2xf32, #tpu.memory_space<smem>>
    %c0_2 = arith.constant 0 : index
    %2 = memref.load %arg4[%c0_2] : memref<1xf32, #tpu.memory_space<smem>>
    %c0_3 = arith.constant 0 : index
    %3 = memref.load %arg6[%c0_3] : memref<1xf32, #tpu.memory_space<smem>>
    %c0_4 = arith.constant 0 : index
    %c0_5 = arith.constant 0 : index
    %4 = vector.load %arg5[%c0_4, %c0_5] : memref<1x512xf32, #tpu.memory_space<vmem>>, vector<1x512xf32>
    %c0_6 = arith.constant 0 : index
    %c0_7 = arith.constant 0 : index
    %5 = vector.load %arg2[%c0_6, %c0_7] : memref<2x512xf32, #tpu.memory_space<vmem>>, vector<2x512xf32>
    %6 = vector.broadcast %0 : f32 to vector<2x512xf32>
    %7 = arith.mulf %5, %6 : vector<2x512xf32>
    %8 = vector.broadcast %2 : f32 to vector<2x512xf32>
    %9 = arith.addf %7, %8 : vector<2x512xf32>
    %cst = arith.constant 0.000000e+00 : f32
    %10 = vector.broadcast %cst : f32 to vector<1x2xf32>
    %c0_8 = arith.constant 0 : index
    %c0_9 = arith.constant 0 : index
    %11 = vector.load %arg1[%c0_8, %c0_9] : memref<2x5120xf32, #tpu.memory_space<vmem>>, vector<2x512xf32>
    %12 = vector.broadcast %1 : f32 to vector<2x512xf32>
    %13 = arith.mulf %11, %12 : vector<2x512xf32>
    %14 = arith.addf %9, %13 : vector<2x512xf32>
    %cst_10 = arith.constant 0.000000e+00 : f32
    %15 = vector.broadcast %cst_10 : f32 to vector<2x512xf32>
    %16 = arith.maximumf %14, %15 : vector<2x512xf32>
    %cst_11 = arith.constant dense<0.000000e+00> : vector<1x2xf32>
    %17 = tpu.matmul %4, %16, %cst_11 {dimension_numbers = #tpu.dot_dimension_numbers<[1], [1], [0], [0], [0, 0, 1, 0], [], []>} : vector<1x512xf32>, vector<2x512xf32>, vector<1x2xf32> -> vector<1x2xf32>
    %18 = vector.broadcast %3 : f32 to vector<1x2xf32>
    %19 = arith.addf %17, %18 : vector<1x2xf32>
    %cst_12 = arith.constant 0.000000e+00 : f32
    %20 = vector.broadcast %cst_12 : f32 to vector<1x2xf32>
    %21 = arith.maximumf %19, %20 : vector<1x2xf32>
    %22 = arith.addf %10, %21 : vector<1x2xf32>
    %c0_13 = arith.constant 0 : index
    %c512 = arith.constant 512 : index
    %23 = vector.load %arg1[%c0_13, %c512] : memref<2x5120xf32, #tpu.memory_space<vmem>>, vector<2x512xf32>
    %24 = vector.broadcast %1 : f32 to vector<2x512xf32>
    %25 = arith.mulf %23, %24 : vector<2x512xf32>
    %26 = arith.addf %9, %25 : vector<2x512xf32>
    %cst_14 = arith.constant 0.000000e+00 : f32
    %27 = vector.broadcast %cst_14 : f32 to vector<2x512xf32>
    %28 = arith.maximumf %26, %27 : vector<2x512xf32>
    %cst_15 = arith.constant dense<0.000000e+00> : vector<1x2xf32>
    %29 = tpu.matmul %4, %28, %cst_15 {dimension_numbers = #tpu.dot_dimension_numbers<[1], [1], [0], [0], [0, 0, 1, 0], [], []>} : vector<1x512xf32>, vector<2x512xf32>, vector<1x2xf32> -> vector<1x2xf32>
    %30 = vector.broadcast %3 : f32 to vector<1x2xf32>
    %31 = arith.addf %29, %30 : vector<1x2xf32>
    %cst_16 = arith.constant 0.000000e+00 : f32
    %32 = vector.broadcast %cst_16 : f32 to vector<1x2xf32>
    %33 = arith.maximumf %31, %32 : vector<1x2xf32>
    %34 = arith.addf %22, %33 : vector<1x2xf32>
    %c0_17 = arith.constant 0 : index
    %c1024 = arith.constant 1024 : index
    %35 = vector.load %arg1[%c0_17, %c1024] : memref<2x5120xf32, #tpu.memory_space<vmem>>, vector<2x512xf32>
    %36 = vector.broadcast %1 : f32 to vector<2x512xf32>
    %37 = arith.mulf %35, %36 : vector<2x512xf32>
    %38 = arith.addf %9, %37 : vector<2x512xf32>
    %cst_18 = arith.constant 0.000000e+00 : f32
    %39 = vector.broadcast %cst_18 : f32 to vector<2x512xf32>
    %40 = arith.maximumf %38, %39 : vector<2x512xf32>
    %cst_19 = arith.constant dense<0.000000e+00> : vector<1x2xf32>
    %41 = tpu.matmul %4, %40, %cst_19 {dimension_numbers = #tpu.dot_dimension_numbers<[1], [1], [0], [0], [0, 0, 1, 0], [], []>} : vector<1x512xf32>, vector<2x512xf32>, vector<1x2xf32> -> vector<1x2xf32>
    %42 = vector.broadcast %3 : f32 to vector<1x2xf32>
    %43 = arith.addf %41, %42 : vector<1x2xf32>
    %cst_20 = arith.constant 0.000000e+00 : f32
    %44 = vector.broadcast %cst_20 : f32 to vector<1x2xf32>
    %45 = arith.maximumf %43, %44 : vector<1x2xf32>
    %46 = arith.addf %34, %45 : vector<1x2xf32>
    %c0_21 = arith.constant 0 : index
    %c1536 = arith.constant 1536 : index
    %47 = vector.load %arg1[%c0_21, %c1536] : memref<2x5120xf32, #tpu.memory_space<vmem>>, vector<2x512xf32>
    %48 = vector.broadcast %1 : f32 to vector<2x512xf32>
    %49 = arith.mulf %47, %48 : vector<2x512xf32>
    %50 = arith.addf %9, %49 : vector<2x512xf32>
    %cst_22 = arith.constant 0.000000e+00 : f32
    %51 = vector.broadcast %cst_22 : f32 to vector<2x512xf32>
    %52 = arith.maximumf %50, %51 : vector<2x512xf32>
    %cst_23 = arith.constant dense<0.000000e+00> : vector<1x2xf32>
    %53 = tpu.matmul %4, %52, %cst_23 {dimension_numbers = #tpu.dot_dimension_numbers<[1], [1], [0], [0], [0, 0, 1, 0], [], []>} : vector<1x512xf32>, vector<2x512xf32>, vector<1x2xf32> -> vector<1x2xf32>
    %54 = vector.broadcast %3 : f32 to vector<1x2xf32>
    %55 = arith.addf %53, %54 : vector<1x2xf32>
    %cst_24 = arith.constant 0.000000e+00 : f32
    %56 = vector.broadcast %cst_24 : f32 to vector<1x2xf32>
    %57 = arith.maximumf %55, %56 : vector<1x2xf32>
    %58 = arith.addf %46, %57 : vector<1x2xf32>
    %c0_25 = arith.constant 0 : index
    %c2048 = arith.constant 2048 : index
    %59 = vector.load %arg1[%c0_25, %c2048] : memref<2x5120xf32, #tpu.memory_space<vmem>>, vector<2x512xf32>
    %60 = vector.broadcast %1 : f32 to vector<2x512xf32>
    %61 = arith.mulf %59, %60 : vector<2x512xf32>
    %62 = arith.addf %9, %61 : vector<2x512xf32>
    %cst_26 = arith.constant 0.000000e+00 : f32
    %63 = vector.broadcast %cst_26 : f32 to vector<2x512xf32>
    %64 = arith.maximumf %62, %63 : vector<2x512xf32>
    %cst_27 = arith.constant dense<0.000000e+00> : vector<1x2xf32>
    %65 = tpu.matmul %4, %64, %cst_27 {dimension_numbers = #tpu.dot_dimension_numbers<[1], [1], [0], [0], [0, 0, 1, 0], [], []>} : vector<1x512xf32>, vector<2x512xf32>, vector<1x2xf32> -> vector<1x2xf32>
    %66 = vector.broadcast %3 : f32 to vector<1x2xf32>
    %67 = arith.addf %65, %66 : vector<1x2xf32>
    %cst_28 = arith.constant 0.000000e+00 : f32
    %68 = vector.broadcast %cst_28 : f32 to vector<1x2xf32>
    %69 = arith.maximumf %67, %68 : vector<1x2xf32>
    %70 = arith.addf %58, %69 : vector<1x2xf32>
    %c0_29 = arith.constant 0 : index
    %c2560 = arith.constant 2560 : index
    %71 = vector.load %arg1[%c0_29, %c2560] : memref<2x5120xf32, #tpu.memory_space<vmem>>, vector<2x512xf32>
    %72 = vector.broadcast %1 : f32 to vector<2x512xf32>
    %73 = arith.mulf %71, %72 : vector<2x512xf32>
    %74 = arith.addf %9, %73 : vector<2x512xf32>
    %cst_30 = arith.constant 0.000000e+00 : f32
    %75 = vector.broadcast %cst_30 : f32 to vector<2x512xf32>
    %76 = arith.maximumf %74, %75 : vector<2x512xf32>
    %cst_31 = arith.constant dense<0.000000e+00> : vector<1x2xf32>
    %77 = tpu.matmul %4, %76, %cst_31 {dimension_numbers = #tpu.dot_dimension_numbers<[1], [1], [0], [0], [0, 0, 1, 0], [], []>} : vector<1x512xf32>, vector<2x512xf32>, vector<1x2xf32> -> vector<1x2xf32>
    %78 = vector.broadcast %3 : f32 to vector<1x2xf32>
    %79 = arith.addf %77, %78 : vector<1x2xf32>
    %cst_32 = arith.constant 0.000000e+00 : f32
    %80 = vector.broadcast %cst_32 : f32 to vector<1x2xf32>
    %81 = arith.maximumf %79, %80 : vector<1x2xf32>
    %82 = arith.addf %70, %81 : vector<1x2xf32>
    %c0_33 = arith.constant 0 : index
    %c3072 = arith.constant 3072 : index
    %83 = vector.load %arg1[%c0_33, %c3072] : memref<2x5120xf32, #tpu.memory_space<vmem>>, vector<2x512xf32>
    %84 = vector.broadcast %1 : f32 to vector<2x512xf32>
    %85 = arith.mulf %83, %84 : vector<2x512xf32>
    %86 = arith.addf %9, %85 : vector<2x512xf32>
    %cst_34 = arith.constant 0.000000e+00 : f32
    %87 = vector.broadcast %cst_34 : f32 to vector<2x512xf32>
    %88 = arith.maximumf %86, %87 : vector<2x512xf32>
    %cst_35 = arith.constant dense<0.000000e+00> : vector<1x2xf32>
    %89 = tpu.matmul %4, %88, %cst_35 {dimension_numbers = #tpu.dot_dimension_numbers<[1], [1], [0], [0], [0, 0, 1, 0], [], []>} : vector<1x512xf32>, vector<2x512xf32>, vector<1x2xf32> -> vector<1x2xf32>
    %90 = vector.broadcast %3 : f32 to vector<1x2xf32>
    %91 = arith.addf %89, %90 : vector<1x2xf32>
    %cst_36 = arith.constant 0.000000e+00 : f32
    %92 = vector.broadcast %cst_36 : f32 to vector<1x2xf32>
    %93 = arith.maximumf %91, %92 : vector<1x2xf32>
    %94 = arith.addf %82, %93 : vector<1x2xf32>
    %c0_37 = arith.constant 0 : index
    %c3584 = arith.constant 3584 : index
    %95 = vector.load %arg1[%c0_37, %c3584] : memref<2x5120xf32, #tpu.memory_space<vmem>>, vector<2x512xf32>
    %96 = vector.broadcast %1 : f32 to vector<2x512xf32>
    %97 = arith.mulf %95, %96 : vector<2x512xf32>
    %98 = arith.addf %9, %97 : vector<2x512xf32>
    %cst_38 = arith.constant 0.000000e+00 : f32
    %99 = vector.broadcast %cst_38 : f32 to vector<2x512xf32>
    %100 = arith.maximumf %98, %99 : vector<2x512xf32>
    %cst_39 = arith.constant dense<0.000000e+00> : vector<1x2xf32>
    %101 = tpu.matmul %4, %100, %cst_39 {dimension_numbers = #tpu.dot_dimension_numbers<[1], [1], [0], [0], [0, 0, 1, 0], [], []>} : vector<1x512xf32>, vector<2x512xf32>, vector<1x2xf32> -> vector<1x2xf32>
    %102 = vector.broadcast %3 : f32 to vector<1x2xf32>
    %103 = arith.addf %101, %102 : vector<1x2xf32>
    %cst_40 = arith.constant 0.000000e+00 : f32
    %104 = vector.broadcast %cst_40 : f32 to vector<1x2xf32>
    %105 = arith.maximumf %103, %104 : vector<1x2xf32>
    %106 = arith.addf %94, %105 : vector<1x2xf32>
    %c0_41 = arith.constant 0 : index
    %c4096 = arith.constant 4096 : index
    %107 = vector.load %arg1[%c0_41, %c4096] : memref<2x5120xf32, #tpu.memory_space<vmem>>, vector<2x512xf32>
    %108 = vector.broadcast %1 : f32 to vector<2x512xf32>
    %109 = arith.mulf %107, %108 : vector<2x512xf32>
    %110 = arith.addf %9, %109 : vector<2x512xf32>
    %cst_42 = arith.constant 0.000000e+00 : f32
    %111 = vector.broadcast %cst_42 : f32 to vector<2x512xf32>
    %112 = arith.maximumf %110, %111 : vector<2x512xf32>
    %cst_43 = arith.constant dense<0.000000e+00> : vector<1x2xf32>
    %113 = tpu.matmul %4, %112, %cst_43 {dimension_numbers = #tpu.dot_dimension_numbers<[1], [1], [0], [0], [0, 0, 1, 0], [], []>} : vector<1x512xf32>, vector<2x512xf32>, vector<1x2xf32> -> vector<1x2xf32>
    %114 = vector.broadcast %3 : f32 to vector<1x2xf32>
    %115 = arith.addf %113, %114 : vector<1x2xf32>
    %cst_44 = arith.constant 0.000000e+00 : f32
    %116 = vector.broadcast %cst_44 : f32 to vector<1x2xf32>
    %117 = arith.maximumf %115, %116 : vector<1x2xf32>
    %118 = arith.addf %106, %117 : vector<1x2xf32>
    %c0_45 = arith.constant 0 : index
    %c4608 = arith.constant 4608 : index
    %119 = vector.load %arg1[%c0_45, %c4608] : memref<2x5120xf32, #tpu.memory_space<vmem>>, vector<2x512xf32>
    %120 = vector.broadcast %1 : f32 to vector<2x512xf32>
    %121 = arith.mulf %119, %120 : vector<2x512xf32>
    %122 = arith.addf %9, %121 : vector<2x512xf32>
    %cst_46 = arith.constant 0.000000e+00 : f32
    %123 = vector.broadcast %cst_46 : f32 to vector<2x512xf32>
    %124 = arith.maximumf %122, %123 : vector<2x512xf32>
    %cst_47 = arith.constant dense<0.000000e+00> : vector<1x2xf32>
    %125 = tpu.matmul %4, %124, %cst_47 {dimension_numbers = #tpu.dot_dimension_numbers<[1], [1], [0], [0], [0, 0, 1, 0], [], []>} : vector<1x512xf32>, vector<2x512xf32>, vector<1x2xf32> -> vector<1x2xf32>
    %126 = vector.broadcast %3 : f32 to vector<1x2xf32>
    %127 = arith.addf %125, %126 : vector<1x2xf32>
    %cst_48 = arith.constant 0.000000e+00 : f32
    %128 = vector.broadcast %cst_48 : f32 to vector<1x2xf32>
    %129 = arith.maximumf %127, %128 : vector<1x2xf32>
    %130 = arith.addf %118, %129 : vector<1x2xf32>
    %cst_49 = arith.constant 1.000000e-01 : f32
    %131 = vector.broadcast %cst_49 : f32 to vector<1x2xf32>
    %132 = arith.mulf %130, %131 : vector<1x2xf32>
    %c0_50 = arith.constant 0 : index
    %c0_51 = arith.constant 0 : index
    %133 = vector.load %arg7[%c0_50, %c0_51] : memref<1x2xf32, #tpu.memory_space<vmem>>, vector<1x2xf32>
    tpu.vector_store %arg7[%c0_50, %c0_51], %132 {strides = array<i32>} : memref<1x2xf32, #tpu.memory_space<vmem>>, vector<1x2xf32>,
    return
  }
  func.func @transform_0(%arg0: i32) -> (i32, i32) {
    %c0_i32 = arith.constant 0 : i32
    %c0_i32_0 = arith.constant 0 : i32
    return %arg0, %c0_i32 : i32, i32
  }
  func.func @transform_1(%arg0: i32) -> (i32, i32) {
    %c0_i32 = arith.constant 0 : i32
    %c0_i32_0 = arith.constant 0 : i32
    return %arg0, %c0_i32 : i32, i32
  }
  func.func @transform_2(%arg0: i32) -> (i32, i32) {
    %c0_i32 = arith.constant 0 : i32
    %c0_i32_0 = arith.constant 0 : i32
    %c0_i32_1 = arith.constant 0 : i32
    return %c0_i32, %c0_i32_0 : i32, i32
  }
  func.func @transform_3(%arg0: i32) -> i32 {
    %c0_i32 = arith.constant 0 : i32
    %c0_i32_0 = arith.constant 0 : i32
    return %c0_i32 : i32
  }
  func.func @transform_4(%arg0: i32) -> (i32, i32) {
    %c0_i32 = arith.constant 0 : i32
    %c0_i32_0 = arith.constant 0 : i32
    %c0_i32_1 = arith.constant 0 : i32
    return %c0_i32, %c0_i32_0 : i32, i32
  }
  func.func @transform_5(%arg0: i32) -> i32 {
    %c0_i32 = arith.constant 0 : i32
    %c0_i32_0 = arith.constant 0 : i32
    return %c0_i32 : i32
  }
  func.func @transform_6(%arg0: i32) -> (i32, i32) {
    %c0_i32 = arith.constant 0 : i32
    %c0_i32_0 = arith.constant 0 : i32
    return %c0_i32, %arg0 : i32, i32
  }
}

</mosaic_0001>

<bundles_post_ra>
// kernel: tpu_custom_call.1
= control target key start
LH: loop header
LB: loop body
LE: loop exit
PB: predicated region body
PF: predicated region fallthrough
CT: control target
= control target key end

     0   :  { %13 = vsyncpa [#allocation5], 0  ;;  %s2044_s0 = inlined_call_operand.hbm [shape: f32[2,5120], index: 0, kind: input, shape index: {}]   ;;  %s2045_s1 = inlined_call_operand.hbm [shape: f32[2,512], index: 1, kind: input, shape index: {}]   ;;  %s2046_s2 = inlined_call_operand.vmem [shape: f32[1,2], index: 2, kind: input, shape index: {}]   ;;  %s2047_s3 = inlined_call_operand.<no memory space> [shape: f32[1], index: 3, kind: input, shape index: {}]   ;;  %s2048_s4 = inlined_call_operand.vmem [shape: f32[1,512], index: 4, kind: input, shape index: {}]   ;;  %s2049_s5 = inlined_call_operand.<no memory space> [shape: f32[1], index: 5, kind: input, shape index: {}]   ;;  %s2050_s6 = inlined_call_operand.hbm [shape: f32[1,2], index: 6, kind: output, shape index: {}]  }
   0x1   :  { %14 = vsyncpa [#allocation9], 0 }
   0x2   :  { %15 = vsyncpa [#allocation7], 0 }
   0x3   :  { %16 = vsyncpa [#allocation6], 0  ;;  %s1882_s21 = smov [#allocation4]   ;;  %s1883_s23 = smov [#allocation8]  }
   0x4   :  { %s23_s22 = sshll.u32 %s1882_s21, 4  ;;  %s33_s24 = sshll.u32 %s1883_s23, 4  ;;  %s24_s22 = int_to_ptr.vmem [resolvable:$true] %s23_s22  ;;  %s34_s24 = int_to_ptr.vmem [resolvable:$true] %s33_s24 }
   0x5   :  { %s1810_s25 = scalar_lea.vmem %s24_s22, 1280  ;;  %p1815_p1 = scmp.lt.s32.totalorder %s24_s22, %s24_s22 }
   0x6   :  { %p1811_p0 = scmp.ne.s32.totalorder %s24_s22, %s1810_s25  ;;  %p1816_p2 = scmp.lt.s32.totalorder %s1810_s25, %s1810_s25 }
   0x8   :  { %p1817_p3 = por %p1816_p2, %p1815_p1 }
   0xa   :  { %p1818_p4 = pnand %p1817_p3, %p1811_p0 }
   0xc   :  { %1821 = shalt.err (!%p1818_p4)
}
   0xd   :  { %26 = dma.hbm_to_vmem [thread:$0]  %s2044_s0, 1280, %s24_s22, [#allocation5]  }
   0xe   :  { %s1830_s28 = scalar_lea.vmem %s34_s24, 128  ;;  %p1835_p6 = scmp.lt.s32.totalorder %s34_s24, %s34_s24 }
   0xf   :  { %p1831_p5 = scmp.ne.s32.totalorder %s34_s24, %s1830_s28  ;;  %p1836_p7 = scmp.lt.s32.totalorder %s1830_s28, %s1830_s28 }
  0x11   :  { %p1837_p8 = por %p1836_p7, %p1835_p6 }
  0x13   :  { %p1838_p9 = pnand %p1837_p8, %p1831_p5 }
  0x15   :  { %1841 = shalt.err (!%p1838_p9)
}
  0x16   :  { %36 = dma.hbm_to_vmem [thread:$0]  %s2045_s1, 128, %s34_s24, [#allocation9]  }
  0x17   :  { %s43_s9 = sshll.u32 %s2046_s2, 4  ;;  %s44_s9 = int_to_ptr.vmem [resolvable:$true] %s43_s9 }
  0x18   :  { %s1842_s10 = scalar_lea.vmem %s44_s9, 16  ;;  %p1847_p11 = scmp.lt.s32.totalorder %s44_s9, %s44_s9 }
  0x19   :  { %p1843_p10 = scmp.ne.s32.totalorder %s44_s9, %s1842_s10  ;;  %p1848_p12 = scmp.lt.s32.totalorder %s1842_s10, %s1842_s10 }
  0x1b   :  { %p1849_p13 = por %p1848_p12, %p1847_p11 }
  0x1d   :  { %p1850_p0 = pnand %p1849_p13, %p1843_p10 }
  0x1f   :  { %1853 = shalt.err (!%p1850_p0)
}
  0x20   :  { %s1884_s0 = smov [#allocation10]  }
  0x21   :  { %46 = dma.vmem_to_smem %s44_s9, 16, %s1884_s0, [#allocation7]  }
  0x22   :  { %1874 = dma.done.wait [#allocation5], 1280  }
  0x23   :  { %1875 = vsyncadd [#allocation5], 4294966016 }
  0x24   :  { %1876 = dma.done.wait [#allocation9], 128  }
  0x25   :  { %1877 = vsyncadd [#allocation9], 4294967168 }
  0x26   :  { %1878 = dma.done.wait [#allocation7], 16  }
  0x27   :  { %1879 = vsyncadd [#allocation7], 4294967280 }
  0x28   :  { %62 = sfence }
  0x29   :  { %s63_s1 = sld [smem:[#allocation10]]  ;;  %v80_v0 = vlaneseq  ;;  %v1885_v2 = vmov 1983009808   ;;  %v67_v4 = vld [vmem:[%s2048_s4] sm:$0xf]  ;;  %v68_v5 = vld [vmem:[#allocation8] sm:$0xff]  ;;  %v71_v8 = vstv %s2047_s3 }
  0x2a   :  { %s1796_s2 = sld [smem:[#allocation10 + $0x1]]  ;;  %v103_v3 = vunpack.c.l.s4 %v1885_v2  ;;  %v73_v9 = vld [vmem:[#allocation4] sm:$0xff]  ;;  %v264_v10 = vld [vmem:[#allocation4 + $0x8] sm:$0xff]  ;;  %v432_v11 = vld [vmem:[#allocation4 + $0x10] sm:$0xff]  ;;  %vm1777_vm0 = vcmask 8192  }
  0x2b   :  { %v1931_v1 = vshrl.u32 %v80_v0, 7  ;;  %v600_v16 = vld [vmem:[#allocation4 + $0x18] sm:$0xff]  ;;  %v768_v19 = vld [vmem:[#allocation4 + $0x20] sm:$0xff]  ;;  %v936_v31 = vld [vmem:[#allocation4 + $0x28] sm:$0xff] }
  0x2c   :  { %v104_v13 = vunpack.c.0.s8 %v103_v3  ;;  %v1104_v43 = vld [vmem:[#allocation4 + $0x30] sm:$0xff]  ;;  %v1272_v59 = vld [vmem:[#allocation4 + $0x38] sm:$0xff] }
  0x2d   :  { %v86_v6 = vsub.s32 1, %v1931_v1  ;;  %v94_v7 = vsub.s32 3, %v1931_v1  ;;  %v82_v35 = vsub.s32 0, %v1931_v1  ;;  %v90_v44 = vsub.s32 2, %v1931_v1 }
  0x2e   :  { %v1956_v25 = vsub.s32 %v104_v13, %v1931_v1 }
  0x2f   :  { %v69_v12 = vstv %s63_s1  ;;  %v1941_v14 = vrot.slane %v67_v4, %v86_v6  ;;  %v1943_v15 = vrot.slane %v67_v4, %v94_v7  ;;  %v1972_v51 = vrot.slane %v67_v4, %v82_v35 }
  0x30   :  { %v70_v17 = vmul.f32 %v69_v12, %v68_v5  ;;  %v1945_v18 = vstv %s1796_s2  ;;  %v1977_v60 = vrot.slane %v67_v4, %v90_v44  ;;  %v1440_v4 = vld [vmem:[#allocation4 + $0x40] sm:$0xff] }
  0x31   :  { %v75_v20 = vmul.f32 %v1945_v18, %v73_v9  ;;  %186 = vmatprep.mubr.f32.mxu0 %v1941_v14  ;;  %v265_v21 = vmul.f32 %v264_v10, %v1945_v18  ;;  %256 = vmatprep.mubr.f32.mxu1 %v1943_v15  ;;  %v433_v22 = vmul.f32 %v432_v11, %v1945_v18 }
  0x32   :  { %v1952_v23 = vadd.f32 %v71_v8, %v70_v17  ;;  %v601_v24 = vmul.f32 %v600_v16, %v1945_v18  ;;  %v769_v26 = vmul.f32 %v768_v19, %v1945_v18  ;;  %v937_v38 = vmul.f32 %v936_v31, %v1945_v18  ;;  %v1608_v16 = vld [vmem:[#allocation4 + $0x48] sm:$0xff] }
  0x33   :  { %v1105_v54 = vmul.f32 %v1104_v43, %v1945_v18  ;;  %v1273_v1 = vmul.f32 %v1272_v59, %v1945_v18  ;;  %v1441_v13 = vmul.f32 %v1440_v4, %v1945_v18 }
  0x34   :  { %v76_v27 = vadd.f32 %v75_v20, %v1952_v23  ;;  %v266_v28 = vadd.f32 %v265_v21, %v1952_v23  ;;  %v434_v29 = vadd.f32 %v433_v22, %v1952_v23  ;;  %v602_v30 = vadd.f32 %v601_v24, %v1952_v23 }
  0x35   :  { %v770_v37 = vadd.f32 %v769_v26, %v1952_v23  ;;  %v938_v53 = vadd.f32 %v937_v38, %v1952_v23  ;;  %v1106_v0 = vadd.f32 %v1105_v54, %v1952_v23  ;;  %v1274_v9 = vadd.f32 %v1273_v1, %v1952_v23 }
  0x36   :  { %v77_v32 = vmax.f32 %v76_v27, 0.0  ;;  %v267_v33 = vmax.f32 %v266_v28, 0.0  ;;  %v435_v34 = vmax.f32 %v434_v29, 0.0  ;;  %v603_v36 = vmax.f32 %v602_v30, 0.0 }
  0x37   :  { %v771_v52 = vmax.f32 %v770_v37, 0.0  ;;  %v939_v63 = vmax.f32 %v938_v53, 0.0  ;;  %v1107_v12 = vmax.f32 %v1106_v0, 0.0  ;;  %v1275_v21 = vmax.f32 %v1274_v9, 0.0 }
  0x38   :  { %v108_v39 = vrot.slane %v77_v32, %v1956_v25  ;;  %v101_v40 = vcombine.high %v77_v32, %v77_v32  ;;  %v276_v41 = vrot.slane %v267_v33, %v1956_v25  ;;  %v269_v42 = vcombine.high %v267_v33, %v267_v33 }
  0x39   :  { %v444_v45 = vrot.slane %v435_v34, %v1956_v25  ;;  %v437_v46 = vcombine.high %v435_v34, %v435_v34  ;;  %v605_v58 = vcombine.high %v603_v36, %v603_v36  ;;  %v612_v62 = vrot.slane %v603_v36, %v1956_v25 }
  0x3a   :  { %v116_v47 = vcombine.high %v108_v39, %v108_v39  ;;  %v115_v48 = vrot.slane %v101_v40, %v1956_v25  ;;  %v284_v49 = vcombine.high %v276_v41, %v276_v41  ;;  %v283_v50 = vrot.slane %v269_v42, %v1956_v25 }
  0x3b   :  { %v451_v57 = vrot.slane %v437_v46, %v1956_v25  ;;  %v452_v61 = vcombine.high %v444_v45, %v444_v45  ;;  %v619_v3 = vrot.slane %v605_v58, %v1956_v25  ;;  %v773_v5 = vcombine.high %v771_v52, %v771_v52 }
  0x3c   :  { %152 = vmatprep.subr.mxu0 %v116_v47  ;;  %v117_v55 = vcombine.high %v115_v48, %v115_v48  ;;  %v285_v56 = vcombine.high %v283_v50, %v283_v50  ;;  %v620_v6 = vcombine.high %v612_v62, %v612_v62  ;;  %v780_v7 = vrot.slane %v771_v52, %v1956_v25 }
  0x3d   :  { %153 = vmatpush1.xpose.msra.mxu0 %v108_v39  ;;  %v453_v2 = vcombine.high %v451_v57, %v451_v57  ;;  %v941_v8 = vcombine.high %v939_v63, %v939_v63  ;;  %v621_v10 = vcombine.high %v619_v3, %v619_v3  ;;  %v787_v11 = vrot.slane %v773_v5, %v1956_v25 }
  0x3e   :  { %222 = vmatprep.subr.mxu1 %v117_v55  ;;  %320 = vmatprep.subr.mxu0 %v284_v49  ;;  %v788_v17 = vcombine.high %v780_v7, %v780_v7  ;;  %v948_v19 = vrot.slane %v939_v63, %v1956_v25  ;;  %v1609_v22 = vmul.f32 %v1608_v16, %v1945_v18 }
  0x3f   :  { %223 = vmatpush1.xpose.msra.mxu1 %v115_v48  ;;  %v955_v20 = vrot.slane %v941_v8, %v1956_v25  ;;  %v789_v24 = vcombine.high %v787_v11, %v787_v11  ;;  %v1109_v26 = vcombine.high %v1107_v12, %v1107_v12  ;;  %v1442_v27 = vadd.f32 %v1441_v13, %v1952_v23 }
  0x40   :  { %187 = vmatmul.mubr.f32.vlgmr.msra.gmra.mxu0 %v1972_v51  ;;  %390 = vmatprep.subr.mxu1 %v285_v56  ;;  %v956_v28 = vcombine.high %v948_v19, %v948_v19  ;;  %v1116_v29 = vrot.slane %v1107_v12, %v1956_v25  ;;  %v1277_v18 = vcombine.high %v1275_v21, %v1275_v21 }
  0x41   :  { %321 = vmatpush1.xpose.msra.mxu0 %v276_v41  ;;  %354 = vmatprep.mubr.f32.mxu0 %v1941_v14  ;;  %v957_v30 = vcombine.high %v955_v20, %v955_v20  ;;  %v1123_v31 = vrot.slane %v1109_v26, %v1956_v25  ;;  %v1443_v32 = vmax.f32 %v1442_v27, 0.0  ;;  %v1610_v33 = vadd.f32 %v1609_v22, %v1952_v23 }
  0x42   :  { %257 = vmatmul.mubr.f32.vlgmr.msra.gmra.mxu1 %v1977_v60  ;;  %488 = vmatprep.subr.mxu0 %v452_v61  ;;  %v1124_v34 = vcombine.high %v1116_v29, %v1116_v29  ;;  %v1284_v35 = vrot.slane %v1275_v21, %v1956_v25  ;;  %v1291_v37 = vrot.slane %v1277_v18, %v1956_v25 }
  0x43   :  { %391 = vmatpush1.xpose.msra.mxu1 %v283_v50  ;;  %424 = vmatprep.mubr.f32.mxu1 %v1943_v15  ;;  %v1125_v36 = vcombine.high %v1123_v31, %v1123_v31  ;;  %v1445_v38 = vcombine.high %v1443_v32, %v1443_v32  ;;  %v1611_v23 = vmax.f32 %v1610_v33, 0.0  ;;  %v1452_v40 = vrot.slane %v1443_v32, %v1956_v25 }
  0x44   :  { %355 = vmatmul.mubr.f32.vlgmr.msra.gmra.mxu0 %v1972_v51  ;;  %558 = vmatprep.subr.mxu1 %v453_v2  ;;  %v1292_v39 = vcombine.high %v1284_v35, %v1284_v35  ;;  %v1293_v41 = vcombine.high %v1291_v37, %v1291_v37 }
  0x45   :  { %489 = vmatpush1.xpose.msra.mxu0 %v444_v45  ;;  %522 = vmatprep.mubr.f32.mxu0 %v1941_v14  ;;  %v1459_v42 = vrot.slane %v1445_v38, %v1956_v25  ;;  %v1613_v43 = vcombine.high %v1611_v23, %v1611_v23  ;;  %v1460_v44 = vcombine.high %v1452_v40, %v1452_v40 }
  0x46   :  { %425 = vmatmul.mubr.f32.vlgmr.msra.gmra.mxu1 %v1977_v60  ;;  %656 = vmatprep.subr.mxu0 %v620_v6  ;;  %v1620_v45 = vrot.slane %v1611_v23, %v1956_v25 }
  0x47   :  { %559 = vmatpush1.xpose.msra.mxu1 %v451_v57  ;;  %592 = vmatprep.mubr.f32.mxu1 %v1943_v15  ;;  %v1461_v46 = vcombine.high %v1459_v42, %v1459_v42  ;;  %v1627_v47 = vrot.slane %v1613_v43, %v1956_v25 }
  0x48   :  { %523 = vmatmul.mubr.f32.vlgmr.msra.gmra.mxu0 %v1972_v51  ;;  %726 = vmatprep.subr.mxu1 %v621_v10  ;;  %v1628_v48 = vcombine.high %v1620_v45, %v1620_v45 }
  0x49   :  { %657 = vmatpush1.xpose.msra.mxu0 %v612_v62  ;;  %690 = vmatprep.mubr.f32.mxu0 %v1941_v14  ;;  %v1629_v49 = vcombine.high %v1627_v47, %v1627_v47 }
  0x4a   :  { %593 = vmatmul.mubr.f32.vlgmr.msra.gmra.mxu1 %v1977_v60  ;;  %824 = vmatprep.subr.mxu0 %v788_v17 }
  0x4b   :  { %727 = vmatpush1.xpose.msra.mxu1 %v619_v3  ;;  %760 = vmatprep.mubr.f32.mxu1 %v1943_v15 }
  0x4c   :  { %691 = vmatmul.mubr.f32.vlgmr.msra.gmra.mxu0 %v1972_v51  ;;  %894 = vmatprep.subr.mxu1 %v789_v24 }
  0x4d   :  { %825 = vmatpush1.xpose.msra.mxu0 %v780_v7  ;;  %858 = vmatprep.mubr.f32.mxu0 %v1941_v14 }
  0x4e   :  { %761 = vmatmul.mubr.f32.vlgmr.msra.gmra.mxu1 %v1977_v60  ;;  %992 = vmatprep.subr.mxu0 %v956_v28 }
  0x4f   :  { %895 = vmatpush1.xpose.msra.mxu1 %v787_v11  ;;  %928 = vmatprep.mubr.f32.mxu1 %v1943_v15 }
  0x50   :  { %859 = vmatmul.mubr.f32.vlgmr.msra.gmra.mxu0 %v1972_v51  ;;  %1062 = vmatprep.subr.mxu1 %v957_v30 }
  0x51   :  { %993 = vmatpush1.xpose.msra.mxu0 %v948_v19  ;;  %1026 = vmatprep.mubr.f32.mxu0 %v1941_v14 }
  0x52   :  { %929 = vmatmul.mubr.f32.vlgmr.msra.gmra.mxu1 %v1977_v60  ;;  %1160 = vmatprep.subr.mxu0 %v1124_v34 }
  0x53   :  { %1063 = vmatpush1.xpose.msra.mxu1 %v955_v20  ;;  %1096 = vmatprep.mubr.f32.mxu1 %v1943_v15 }
  0x54   :  { %1027 = vmatmul.mubr.f32.vlgmr.msra.gmra.mxu0 %v1972_v51  ;;  %1230 = vmatprep.subr.mxu1 %v1125_v36 }
  0x55   :  { %1161 = vmatpush1.xpose.msra.mxu0 %v1116_v29  ;;  %1194 = vmatprep.mubr.f32.mxu0 %v1941_v14 }
  0x56   :  { %1097 = vmatmul.mubr.f32.vlgmr.msra.gmra.mxu1 %v1977_v60  ;;  %1328 = vmatprep.subr.mxu0 %v1292_v39 }
  0x57   :  { %1231 = vmatpush1.xpose.msra.mxu1 %v1123_v31  ;;  %1264 = vmatprep.mubr.f32.mxu1 %v1943_v15 }
  0x58   :  { %1195 = vmatmul.mubr.f32.vlgmr.msra.gmra.mxu0 %v1972_v51  ;;  %1398 = vmatprep.subr.mxu1 %v1293_v41 }
  0x59   :  { %1329 = vmatpush1.xpose.msra.mxu0 %v1284_v35  ;;  %1362 = vmatprep.mubr.f32.mxu0 %v1941_v14 }
  0x5a   :  { %1265 = vmatmul.mubr.f32.vlgmr.msra.gmra.mxu1 %v1977_v60  ;;  %1496 = vmatprep.subr.mxu0 %v1460_v44 }
  0x5b   :  { %1399 = vmatpush1.xpose.msra.mxu1 %v1291_v37  ;;  %1432 = vmatprep.mubr.f32.mxu1 %v1943_v15 }
  0x5c   :  { %1363 = vmatmul.mubr.f32.vlgmr.msra.gmra.mxu0 %v1972_v51  ;;  %1566 = vmatprep.subr.mxu1 %v1461_v46 }
  0x5d   :  { %1497 = vmatpush1.xpose.msra.mxu0 %v1452_v40  ;;  %1530 = vmatprep.mubr.f32.mxu0 %v1941_v14 }
  0x5e   :  { %1433 = vmatmul.mubr.f32.vlgmr.msra.gmra.mxu1 %v1977_v60  ;;  %1664 = vmatprep.subr.mxu0 %v1628_v48 }
  0x5f   :  { %1567 = vmatpush1.xpose.msra.mxu1 %v1459_v42  ;;  %1600 = vmatprep.mubr.f32.mxu1 %v1943_v15 }
  0x60   :  { %1531 = vmatmul.mubr.f32.vlgmr.msra.gmra.mxu0 %v1972_v51  ;;  %1734 = vmatprep.subr.mxu1 %v1629_v49 }
  0x61   :  { %1665 = vmatpush1.xpose.msra.mxu0 %v1620_v45  ;;  %1698 = vmatprep.mubr.f32.mxu0 %v1941_v14 }
  0x62   :  { %1601 = vmatmul.mubr.f32.vlgmr.msra.gmra.mxu1 %v1977_v60 }
  0x63   :  { %1735 = vmatpush1.xpose.msra.mxu1 %v1627_v47  ;;  %1768 = vmatprep.mubr.f32.mxu1 %v1943_v15  ;;  %v78_v15 = vstv %s2049_s5  ;;  %s1886_s5 = smov [#allocation11]  }
  0x64   :  { %1699 = vmatmul.mubr.f32.vlgmr.msra.gmra.mxu0 %v1972_v51  ;;  %s1785_s15 = sshll.u32 %s1886_s5, 4  ;;  %s1786_s15 = int_to_ptr.vmem [resolvable:$true] %s1785_s15 }
  0x65   :  { %s1854_s16 = scalar_lea.vmem %s1786_s15, 16  ;;  %s1858_s17 = scalar_lea.vmem %s1786_s15, 32 }
  0x66   :  { %1769 = vmatmul.mubr.f32.vlgmr.msra.gmra.mxu1 %v1977_v60  ;;  %p1855_p1 = scmp.ne.s32.totalorder %s1786_s15, %s1854_s16  ;;  %p1859_p2 = scmp.lt.s32.totalorder %s1786_s15, %s1786_s15 }
  0x67   :  { %p1860_p3 = scmp.lt.s32.totalorder %s1858_s17, %s1854_s16 }
  0x69   :  { %p1861_p4 = por %p1860_p3, %p1859_p2 }
  0x6b   :  { %p1862_p5 = pnand %p1861_p4, %p1855_p1 }
 0x100   :  { %v188_v25 = vpop.f32.mrf.mxu0 }
 0x101   :  { %v189_v2 = vadd.f32 %v188_v25, %v78_v15 }
 0x102   :  { %v190_v50 = vpop.f32.mrf.mxu0  ;;  %v258_v52 = vpop.f32.mrf.mxu1 }
 0x103   :  { %v259_v10 = vadd.f32 %v258_v52, %v189_v2 }
 0x104   :  { %v260_v53 = vpop.f32.mrf.mxu1  ;;  %v356_v54 = vpop.f32.mrf.mxu0 }
 0x105   :  { %v357_v60 = vadd.f32 %v356_v54, %v78_v15  ;;  %v262_v24 = vmax.f32 %v259_v10, 0.0 }
 0x106   :  { %v358_v55 = vpop.f32.mrf.mxu0  ;;  %v426_v56 = vpop.f32.mrf.mxu1 }
 0x107   :  { %v427_v6 = vadd.f32 %v426_v56, %v357_v60 }
 0x108   :  { %v428_v57 = vpop.f32.mrf.mxu1  ;;  %v524_v58 = vpop.f32.mrf.mxu0 }
 0x109   :  { %v525_v3 = vadd.f32 %v524_v58, %v78_v15  ;;  %v430_v17 = vmax.f32 %v427_v6, 0.0 }
 0x10a   :  { %v526_v59 = vpop.f32.mrf.mxu0  ;;  %v594_v14 = vpop.f32.mrf.mxu1 }
 0x10b   :  { %v595_v11 = vadd.f32 %v594_v14, %v525_v3  ;;  %v431_v30 = vadd.f32 %v430_v17, %v262_v24 }
 0x10c   :  { %v596_v61 = vpop.f32.mrf.mxu1  ;;  %v692_v62 = vpop.f32.mrf.mxu0 }
 0x10d   :  { %v693_v7 = vadd.f32 %v692_v62, %v78_v15  ;;  %v598_v26 = vmax.f32 %v595_v11, 0.0 }
 0x10e   :  { %v694_v51 = vpop.f32.mrf.mxu0  ;;  %v762_v63 = vpop.f32.mrf.mxu1 }
 0x10f   :  { %v763_v19 = vadd.f32 %v762_v63, %v693_v7  ;;  %v599_v35 = vadd.f32 %v598_v26, %v431_v30 }
 0x110   :  { %v764_v0 = vpop.f32.mrf.mxu1  ;;  %v860_v1 = vpop.f32.mrf.mxu0 }
 0x111   :  { %v861_v12 = vadd.f32 %v860_v1, %v78_v15  ;;  %v766_v31 = vmax.f32 %v763_v19, 0.0 }
 0x112   :  { %v862_v5 = vpop.f32.mrf.mxu0  ;;  %v930_v4 = vpop.f32.mrf.mxu1 }
 0x113   :  { %v931_v27 = vadd.f32 %v930_v4, %v861_v12  ;;  %v767_v40 = vadd.f32 %v766_v31, %v599_v35 }
 0x114   :  { %v932_v8 = vpop.f32.mrf.mxu1  ;;  %v1028_v9 = vpop.f32.mrf.mxu0 }
 0x115   :  { %v1029_v20 = vadd.f32 %v1028_v9, %v78_v15  ;;  %v934_v36 = vmax.f32 %v931_v27, 0.0 }
 0x116   :  { %v1030_v13 = vpop.f32.mrf.mxu0  ;;  %v1098_v16 = vpop.f32.mrf.mxu1 }
 0x117   :  { %v1099_v32 = vadd.f32 %v1098_v16, %v1029_v20  ;;  %v935_v45 = vadd.f32 %v934_v36, %v767_v40 }
 0x118   :  { %v1100_v21 = vpop.f32.mrf.mxu1  ;;  %v1196_v22 = vpop.f32.mrf.mxu0 }
 0x119   :  { %v1197_v28 = vadd.f32 %v1196_v22, %v78_v15  ;;  %v1102_v41 = vmax.f32 %v1099_v32, 0.0 }
 0x11a   :  { %v1198_v29 = vpop.f32.mrf.mxu0  ;;  %v1266_v18 = vpop.f32.mrf.mxu1 }
 0x11b   :  { %v1267_v37 = vadd.f32 %v1266_v18, %v1197_v28  ;;  %v1103_v25 = vadd.f32 %v1102_v41, %v935_v45 }
 0x11c   :  { %v1268_v33 = vpop.f32.mrf.mxu1  ;;  %v1364_v34 = vpop.f32.mrf.mxu0 }
 0x11d   :  { %v1365_v38 = vadd.f32 %v1364_v34, %v78_v15  ;;  %v1270_v46 = vmax.f32 %v1267_v37, 0.0 }
 0x11e   :  { %v1366_v23 = vpop.f32.mrf.mxu0  ;;  %v1434_v39 = vpop.f32.mrf.mxu1 }
 0x11f   :  { %v1435_v42 = vadd.f32 %v1434_v39, %v1365_v38  ;;  %v1271_v55 = vadd.f32 %v1270_v46, %v1103_v25 }
 0x120   :  { %v1436_v43 = vpop.f32.mrf.mxu1  ;;  %v1532_v44 = vpop.f32.mrf.mxu0 }
 0x121   :  { %v1533_v47 = vadd.f32 %v1532_v44, %v78_v15  ;;  %v1438_v50 = vmax.f32 %v1435_v42, 0.0 }
 0x122   :  { %v1534_v48 = vpop.f32.mrf.mxu0  ;;  %v1602_v49 = vpop.f32.mrf.mxu1 }
 0x123   :  { %v1603_v52 = vadd.f32 %v1602_v49, %v1533_v47  ;;  %v1439_v14 = vadd.f32 %v1438_v50, %v1271_v55 }
 0x124   :  { %v1604_v53 = vpop.f32.mrf.mxu1  ;;  %v1700_v54 = vpop.f32.mrf.mxu0 }
 0x125   :  { %v1606_v56 = vmax.f32 %v1603_v52, 0.0  ;;  %v1701_v57 = vadd.f32 %v1700_v54, %v78_v15 }
 0x126   :  { %v1702_v58 = vpop.f32.mrf.mxu0  ;;  %v1770_v59 = vpop.f32.mrf.mxu1 }
 0x127   :  { %v1771_v61 = vadd.f32 %v1770_v59, %v1701_v57  ;;  %v1607_v51 = vadd.f32 %v1606_v56, %v1439_v14 }
 0x128   :  { %v1772_v62 = vpop.f32.mrf.mxu1 }
 0x129   :  { %v1774_v63 = vmax.f32 %v1771_v61, 0.0 }
 0x12b   :  { %v1775_v60 = vadd.f32 %v1774_v63, %v1607_v51 }
 0x12d   :  { %v1776_v0 = vmul.f32 0.1, %v1775_v60 }
 0x12f   :  { %1778 = vst.msk [vmem:[#allocation11] sm:$0x1] %vm1777_vm0, %v1776_v0 }
 0x130   :  { %1865 = shalt.err (!%p1862_p5)
}
 0x131   :  { %1788 = dma.vmem_to_hbm [thread:$0]  %s1786_s15, 16, %s2050_s6, [#allocation6]  }
 0x132   :  { %1880 = dma.done.wait [#allocation6], 16  }
 0x133   :  { %1881 = vsyncadd [#allocation6], 4294967280 }
 0x134   :  { %1792 = vsyncpa [#allocation5], 1 }
 0x135   :  { %1793 = vsyncpa [#allocation9], 1 }
 0x136   :  { %1794 = vsyncpa [#allocation6], 1 }
 0x137   :  { %1795 = vsyncpa [#allocation7], 1 }

</bundles_post_ra>
